<compile_context>
chip_gen: v6e
topology: v6e:2x2x1
jax: 0.10.0
libtpu: 0.0.40
codegen_flags: <defaults>
</compile_context>

<pallas_src>
import functools

import numpy as np
import jax
import jax.numpy as jnp
from jax.experimental import pallas as pl
from jax.experimental.pallas import tpu as pltpu


# Tap order matches the flattened (kh, kw) order of the 3x3 weights: t = kh*3 + kw.
_TAPS = tuple((kh - 1, kw - 1) for kh in range(3) for kw in range(3))


@functools.lru_cache(maxsize=None)
def _tap_masks(h, w):
    """(9, h*w) float32 border-validity masks: replaces the 'same' zero padding."""
    hh = np.arange(h)[:, None]
    ww = np.arange(w)[None, :]
    m = np.zeros((9, h * w), np.float32)
    for t, (dh, dw) in enumerate(_TAPS):
        valid = (hh + dh >= 0) & (hh + dh < h) & (ww + dw >= 0) & (ww + dw < w)
        m[t] = valid.reshape(-1).astype(np.float32)
    return m


def _collapse_tta_branches(weight, bias):
    """Collapse the 6 TTA branches of the *linear* conv head into one weight/bias.

    Exact identities (cross-correlation, stride 1, symmetric 'same' zero pad):
      * flipud (batch flip) branch == base branch for any per-sample model -> x2.
      * fliplr on NCHW flips channels:
        fliplr(conv(fliplr(x), w) + b) == conv(x, w[::-1, ::-1]) + b[::-1].
      * rot90 branch:
        rot90(conv(rot90(x, k), w), -k) == conv(x, rot90(w, -k, spatial)) + b.
    Summing all branches and dividing by 6 is exact because the head is linear.
    """
    cout, cin, kh, kw = weight.shape
    assert (kh, kw) == (3, 3)
    w_sum = (2.0 * weight
             + weight[::-1, ::-1]
             + jnp.rot90(weight, -1, axes=(2, 3))
             + jnp.rot90(weight, -2, axes=(2, 3))
             + jnp.rot90(weight, -3, axes=(2, 3))) / 6.0
    b_sum = (2.0 * bias + bias[::-1] + 3.0 * bias) / 6.0
    return w_sum.astype(jnp.float32), b_sum.astype(jnp.float32)


# ---------------------------------------------------------------------------
# Single-step fused TTA kernel: whole batch packed into sublanes, one grid step.
# ---------------------------------------------------------------------------
def _tta_conv_kernel(n, c, w_img, x_ref, mw_ref, b_ref, o_ref):
    # x_ref : (N*C, S)     batch packed onto sublanes, H*W flattened onto lanes
    # mw_ref: (9, N*C, S)  per-tap border masks with collapsed tap weights folded in
    # b_ref : (1,)         collapsed bias (cout=1), SMEM
    # o_ref : (N, S)       averaged TTA logits (1/6 already folded into mw/bias)
    s = x_ref.shape[1]
    x = x_ref[...]

    # Three independent partial accumulators break the serial 9-MAC chain so the
    # VLIW packer can fill the VALU slots.
    parts = [jnp.zeros_like(x) for _ in range(3)]
    for t, (dh, dw) in enumerate(_TAPS):
        off = dh * w_img + dw
        if off == 0:
            shifted = x                                       # center tap: no shift
        else:
            # 'same' zero-padded conv tap == circular lane roll; border handled by
            # the zeroed entries already baked into mw_ref.
            shifted = pltpu.roll(x, shift=(-off) % s, axis=1)  # XLU slot
        parts[t % 3] = parts[t % 3] + shifted * mw_ref[t]      # (N*C, S) MAC

    acc = (parts[0] + parts[1]) + parts[2]                     # (N*C, S)
    bias = b_ref[0]
    for bi in range(n):
        grp = acc[bi * c:(bi + 1) * c, :]                      # static slice (C, S)
        y = jnp.sum(grp, axis=0, keepdims=True) + bias         # (1, S)
        o_ref[pl.ds(bi, 1), :] = y.astype(o_ref.dtype)


def _tta_fused_call(x, w_c, b_c):
    n, c, h, wd = x.shape
    cout = w_c.shape[0]
    assert cout == 1  # marinedebrisdetector head outputs 1-channel logits
    s = h * wd

    x_packed = x.reshape(n * c, s).astype(jnp.float32)         # (N*C, S) sublane-packed
    masks = jnp.asarray(_tap_masks(h, wd))                     # (9, S)
    w_taps = w_c.reshape(cout, c, 9)[0].T                      # (9, C), tap-major
    w_sub = jnp.tile(w_taps, (1, n))                           # (9, N*C): sublane = b*C+ci
    mw = masks[:, None, :] * w_sub[:, :, None]                 # (9, N*C, S) weighted masks

    kernel = functools.partial(_tta_conv_kernel, n, c, wd)
    out = pl.pallas_call(
        kernel,
        out_shape=jax.ShapeDtypeStruct((n, s), jnp.float32),
        grid_spec=pltpu.PrefetchScalarGridSpec(
            num_scalar_prefetch=0,
            grid=(1,),
            in_specs=[
                pl.BlockSpec((n * c, s), lambda i: (0, 0)),          # packed input
                pl.BlockSpec((9, n * c, s), lambda i: (0, 0, 0)),    # weighted masks
                pl.BlockSpec(memory_space=pltpu.MemorySpace.SMEM),   # collapsed bias
            ],
            out_specs=pl.BlockSpec((n, s), lambda i: (0, 0)),
        ),
        compiler_params=pltpu.CompilerParams(
            dimension_semantics=("arbitrary",)),
    )(x_packed, mw, b_c)
    return out.reshape(n, cout, h, wd)


# ---------------------------------------------------------------------------
# Synthetic stand-in for the segmentation model (deterministic init).
# ---------------------------------------------------------------------------
class SyntheticSegModel:
    def __init__(self, cin=4, cout=1, threshold=0.5, key=jax.random.PRNGKey(42)):
        kw, kb = jax.random.split(key)
        self.cin, self.cout = cin, cout
        self.threshold = threshold  # mirrors model.threshold used by the wrapper
        self.weight = 0.1 * jax.random.normal(kw, (cout, cin, 3, 3), jnp.float32)
        self.bias = 0.1 * jax.random.normal(kb, (cout,), jnp.float32)


# ---------------------------------------------------------------------------
# TestTimeAugmentation_wapper — same forward semantics, fully fused on TPU.
# ---------------------------------------------------------------------------
class TestTimeAugmentationWrapper:
    def __init__(self, model):
        self.model = model
        self.threshold = model.threshold
        # Exact trace-time collapse of the 6 TTA branches for the linear conv head.
        self._w_c, self._b_c = _collapse_tta_branches(model.weight, model.bias)

    def __call__(self, x):
        return _tta_fused_call(x, self._w_c, self._b_c)


# ---------------------------------------------------------------------------
# Pure-JAX reference: the literal 6-branch TTA (exact PyTorch semantics).
# ---------------------------------------------------------------------------
def _ref_model(x, w, b):
    y = jax.lax.conv_general_dilated(
        x, w, window_strides=(1, 1), padding="SAME",
        dimension_numbers=("NCHW", "OIHW", "NCHW"))
    return y + b.reshape(1, -1, 1, 1)


def _ref_tta(x, w, b):
    m = lambda t: _ref_model(t, w, b)
    y = m(x)
    # torch.fliplr == flip dim 1 (channels of NCHW)
    y = y + jnp.flip(m(jnp.flip(x, axis=1)), axis=1)
    # torch.flipud == flip dim 0 (batch)
    y = y + jnp.flip(m(jnp.flip(x, axis=0)), axis=0)
    for rot in (1, 2, 3):
        y = y + jnp.rot90(m(jnp.rot90(x, rot, axes=(2, 3))), -rot, axes=(2, 3))
    return y / 6.0


if __name__ == "__main__":
    N, C, H, W = 2, 4, 16, 16
    x = jax.random.normal(jax.random.PRNGKey(0), (N, C, H, W), jnp.float32)

    model = SyntheticSegModel(cin=C, cout=1, threshold=0.5)
    tta = TestTimeAugmentationWrapper(model)
    tta_fn = jax.jit(tta.__call__)

    y = tta_fn(x)
    jax.block_until_ready(y)

    y_ref = _ref_tta(x, model.weight, model.bias)
    assert y.shape == (N, 1, H, W)
    assert jnp.allclose(y, y_ref, atol=1e-4, rtol=1e-4), "mismatch vs pure-JAX reference"

    print("KERNEL_OK")
</pallas_src>

<mosaic_0001>
module attributes {stable_mosaic.version = 11 : i64} {
  func.func @_tta_conv_kernel(%arg0: i32, %arg1: memref<8x256xf32, #tpu.memory_space<vmem>>, %arg2: memref<9x8x256xf32, #tpu.memory_space<vmem>>, %arg3: memref<1xf32, #tpu.memory_space<smem>>, %arg4: memref<2x256xf32, #tpu.memory_space<vmem>>) attributes {dimension_semantics = [#tpu.dimension_semantics<arbitrary>], iteration_bounds = array<i64: 1>, scalar_prefetch = 0 : i64, scratch_operands = 0 : i64, tpu.core_type = #tpu.core_type<tc>, window_params = [{pipeline_mode = #tpu.pipeline_mode<synchronous>, transform_indices = @transform_0, window_bounds = array<i64: 8, 256>}, {pipeline_mode = #tpu.pipeline_mode<synchronous>, transform_indices = @transform_1, window_bounds = array<i64: 9, 8, 256>}, {transform_indices = @transform_2, window_bounds = array<i64: 1>}, {pipeline_mode = #tpu.pipeline_mode<synchronous>, transform_indices = @transform_3, window_bounds = array<i64: 2, 256>}]} {
    %c0 = arith.constant 0 : index
    %c0_0 = arith.constant 0 : index
    %0 = vector.load %arg1[%c0, %c0_0] : memref<8x256xf32, #tpu.memory_space<vmem>>, vector<8x256xf32>
    %cst = arith.constant 0.000000e+00 : f32
    %1 = vector.broadcast %cst : f32 to vector<8x256xf32>
    %cst_1 = arith.constant 0.000000e+00 : f32
    %2 = vector.broadcast %cst_1 : f32 to vector<8x256xf32>
    %cst_2 = arith.constant 0.000000e+00 : f32
    %3 = vector.broadcast %cst_2 : f32 to vector<8x256xf32>
    %c17_i32 = arith.constant 17 : i32
    %4 = tpu.dynamic_rotate %0 by %c17_i32 dim 1 : vector<8x256xf32>, i32 -> vector<8x256xf32>
    %c0_3 = arith.constant 0 : index
    %c0_4 = arith.constant 0 : index
    %c0_5 = arith.constant 0 : index
    %5 = vector.load %arg2[%c0_3, %c0_4, %c0_5] : memref<9x8x256xf32, #tpu.memory_space<vmem>>, vector<1x8x256xf32>
    %6 = vector.shape_cast %5 : vector<1x8x256xf32> to vector<8x256xf32>
    %7 = arith.mulf %4, %6 : vector<8x256xf32>
    %8 = arith.addf %1, %7 : vector<8x256xf32>
    %c16_i32 = arith.constant 16 : i32
    %9 = tpu.dynamic_rotate %0 by %c16_i32 dim 1 : vector<8x256xf32>, i32 -> vector<8x256xf32>
    %c1 = arith.constant 1 : index
    %c0_6 = arith.constant 0 : index
    %c0_7 = arith.constant 0 : index
    %10 = vector.load %arg2[%c1, %c0_6, %c0_7] : memref<9x8x256xf32, #tpu.memory_space<vmem>>, vector<1x8x256xf32>
    %11 = vector.shape_cast %10 : vector<1x8x256xf32> to vector<8x256xf32>
    %12 = arith.mulf %9, %11 : vector<8x256xf32>
    %13 = arith.addf %2, %12 : vector<8x256xf32>
    %c15_i32 = arith.constant 15 : i32
    %14 = tpu.dynamic_rotate %0 by %c15_i32 dim 1 : vector<8x256xf32>, i32 -> vector<8x256xf32>
    %c2 = arith.constant 2 : index
    %c0_8 = arith.constant 0 : index
    %c0_9 = arith.constant 0 : index
    %15 = vector.load %arg2[%c2, %c0_8, %c0_9] : memref<9x8x256xf32, #tpu.memory_space<vmem>>, vector<1x8x256xf32>
    %16 = vector.shape_cast %15 : vector<1x8x256xf32> to vector<8x256xf32>
    %17 = arith.mulf %14, %16 : vector<8x256xf32>
    %18 = arith.addf %3, %17 : vector<8x256xf32>
    %c1_i32 = arith.constant 1 : i32
    %19 = tpu.dynamic_rotate %0 by %c1_i32 dim 1 : vector<8x256xf32>, i32 -> vector<8x256xf32>
    %c3 = arith.constant 3 : index
    %c0_10 = arith.constant 0 : index
    %c0_11 = arith.constant 0 : index
    %20 = vector.load %arg2[%c3, %c0_10, %c0_11] : memref<9x8x256xf32, #tpu.memory_space<vmem>>, vector<1x8x256xf32>
    %21 = vector.shape_cast %20 : vector<1x8x256xf32> to vector<8x256xf32>
    %22 = arith.mulf %19, %21 : vector<8x256xf32>
    %23 = arith.addf %8, %22 : vector<8x256xf32>
    %c4 = arith.constant 4 : index
    %c0_12 = arith.constant 0 : index
    %c0_13 = arith.constant 0 : index
    %24 = vector.load %arg2[%c4, %c0_12, %c0_13] : memref<9x8x256xf32, #tpu.memory_space<vmem>>, vector<1x8x256xf32>
    %25 = vector.shape_cast %24 : vector<1x8x256xf32> to vector<8x256xf32>
    %26 = arith.mulf %0, %25 : vector<8x256xf32>
    %27 = arith.addf %13, %26 : vector<8x256xf32>
    %c255_i32 = arith.constant 255 : i32
    %28 = tpu.dynamic_rotate %0 by %c255_i32 dim 1 : vector<8x256xf32>, i32 -> vector<8x256xf32>
    %c5 = arith.constant 5 : index
    %c0_14 = arith.constant 0 : index
    %c0_15 = arith.constant 0 : index
    %29 = vector.load %arg2[%c5, %c0_14, %c0_15] : memref<9x8x256xf32, #tpu.memory_space<vmem>>, vector<1x8x256xf32>
    %30 = vector.shape_cast %29 : vector<1x8x256xf32> to vector<8x256xf32>
    %31 = arith.mulf %28, %30 : vector<8x256xf32>
    %32 = arith.addf %18, %31 : vector<8x256xf32>
    %c241_i32 = arith.constant 241 : i32
    %33 = tpu.dynamic_rotate %0 by %c241_i32 dim 1 : vector<8x256xf32>, i32 -> vector<8x256xf32>
    %c6 = arith.constant 6 : index
    %c0_16 = arith.constant 0 : index
    %c0_17 = arith.constant 0 : index
    %34 = vector.load %arg2[%c6, %c0_16, %c0_17] : memref<9x8x256xf32, #tpu.memory_space<vmem>>, vector<1x8x256xf32>
    %35 = vector.shape_cast %34 : vector<1x8x256xf32> to vector<8x256xf32>
    %36 = arith.mulf %33, %35 : vector<8x256xf32>
    %37 = arith.addf %23, %36 : vector<8x256xf32>
    %c240_i32 = arith.constant 240 : i32
    %38 = tpu.dynamic_rotate %0 by %c240_i32 dim 1 : vector<8x256xf32>, i32 -> vector<8x256xf32>
    %c7 = arith.constant 7 : index
    %c0_18 = arith.constant 0 : index
    %c0_19 = arith.constant 0 : index
    %39 = vector.load %arg2[%c7, %c0_18, %c0_19] : memref<9x8x256xf32, #tpu.memory_space<vmem>>, vector<1x8x256xf32>
    %40 = vector.shape_cast %39 : vector<1x8x256xf32> to vector<8x256xf32>
    %41 = arith.mulf %38, %40 : vector<8x256xf32>
    %42 = arith.addf %27, %41 : vector<8x256xf32>
    %c239_i32 = arith.constant 239 : i32
    %43 = tpu.dynamic_rotate %0 by %c239_i32 dim 1 : vector<8x256xf32>, i32 -> vector<8x256xf32>
    %c8 = arith.constant 8 : index
    %c0_20 = arith.constant 0 : index
    %c0_21 = arith.constant 0 : index
    %44 = vector.load %arg2[%c8, %c0_20, %c0_21] : memref<9x8x256xf32, #tpu.memory_space<vmem>>, vector<1x8x256xf32>
    %45 = vector.shape_cast %44 : vector<1x8x256xf32> to vector<8x256xf32>
    %46 = arith.mulf %43, %45 : vector<8x256xf32>
    %47 = arith.addf %32, %46 : vector<8x256xf32>
    %48 = arith.addf %37, %42 : vector<8x256xf32>
    %49 = arith.addf %48, %47 : vector<8x256xf32>
    %c0_22 = arith.constant 0 : index
    %50 = memref.load %arg3[%c0_22] : memref<1xf32, #tpu.memory_space<smem>>
    %51 = vector.extract_strided_slice %49 {offsets = [0, 0], sizes = [4, 256], strides = [1, 1]} : vector<8x256xf32> to vector<4x256xf32>
    %cst_23 = arith.constant dense<0.000000e+00> : vector<256xf32>
    %52 = vector.multi_reduction <add>, %51, %cst_23 [0] : vector<4x256xf32> to vector<256xf32>
    %53 = vector.shape_cast %52 : vector<256xf32> to vector<1x256xf32>
    %54 = vector.broadcast %50 : f32 to vector<1x256xf32>
    %55 = arith.addf %53, %54 : vector<1x256xf32>
    %c0_24 = arith.constant 0 : index
    %c0_25 = arith.constant 0 : index
    %56 = vector.load %arg4[%c0_24, %c0_25] : memref<2x256xf32, #tpu.memory_space<vmem>>, vector<1x256xf32>
    tpu.vector_store %arg4[%c0_24, %c0_25], %55 {strides = array<i32>} : memref<2x256xf32, #tpu.memory_space<vmem>>, vector<1x256xf32>,
    %57 = vector.extract_strided_slice %49 {offsets = [4, 0], sizes = [4, 256], strides = [1, 1]} : vector<8x256xf32> to vector<4x256xf32>
    %cst_26 = arith.constant dense<0.000000e+00> : vector<256xf32>
    %58 = vector.multi_reduction <add>, %57, %cst_26 [0] : vector<4x256xf32> to vector<256xf32>
    %59 = vector.shape_cast %58 : vector<256xf32> to vector<1x256xf32>
    %60 = vector.broadcast %50 : f32 to vector<1x256xf32>
    %61 = arith.addf %59, %60 : vector<1x256xf32>
    %c1_27 = arith.constant 1 : index
    %c0_28 = arith.constant 0 : index
    %62 = vector.load %arg4[%c1_27, %c0_28] : memref<2x256xf32, #tpu.memory_space<vmem>>, vector<1x256xf32>
    tpu.vector_store %arg4[%c1_27, %c0_28], %61 {strides = array<i32>} : memref<2x256xf32, #tpu.memory_space<vmem>>, vector<1x256xf32>,
    return
  }
  func.func @transform_0(%arg0: i32) -> (i32, i32) {
    %c0_i32 = arith.constant 0 : i32
    %c0_i32_0 = arith.constant 0 : i32
    %c0_i32_1 = arith.constant 0 : i32
    return %c0_i32, %c0_i32_0 : i32, i32
  }
  func.func @transform_1(%arg0: i32) -> (i32, i32, i32) {
    %c0_i32 = arith.constant 0 : i32
    %c0_i32_0 = arith.constant 0 : i32
    %c0_i32_1 = arith.constant 0 : i32
    %c0_i32_2 = arith.constant 0 : i32
    return %c0_i32, %c0_i32_0, %c0_i32_1 : i32, i32, i32
  }
  func.func @transform_2(%arg0: i32) -> i32 {
    %c0_i32 = arith.constant 0 : i32
    %c0_i32_0 = arith.constant 0 : i32
    return %c0_i32 : i32
  }
  func.func @transform_3(%arg0: i32) -> (i32, i32) {
    %c0_i32 = arith.constant 0 : i32
    %c0_i32_0 = arith.constant 0 : i32
    %c0_i32_1 = arith.constant 0 : i32
    return %c0_i32, %c0_i32_0 : i32, i32
  }
}

</mosaic_0001>

<bundles_post_ra>
// kernel: a_call__.1
= control target key start
LH: loop header
LB: loop body
LE: loop exit
PB: predicated region body
PF: predicated region fallthrough
CT: control target
= control target key end

     0   :  { %s255_s14 = smov 16   ;;  %s256_s15 = smov 17   ;;  %v21_v6 = vlaneseq  ;;  %vm142_vm8 = vcmask 1043456   ;;  %s386_s0 = inlined_call_operand.vmem [shape: f32[8,256], index: 0, kind: input, shape index: {}]   ;;  %s387_s1 = inlined_call_operand.vmem [shape: f32[9,8,256], index: 1, kind: input, shape index: {}]   ;;  %s388_s2 = inlined_call_operand.<no memory space> [shape: f32[1], index: 2, kind: input, shape index: {}]   ;;  %s389_s3 = inlined_call_operand.vmem [shape: f32[2,256], index: 3, kind: output, shape index: {}]  }
   0x1   :  { %v15_v0 = vld [vmem:[%s386_s0] sm:$0xff]  ;;  %v16_v1 = vld [vmem:[%s386_s0 + $0x8] sm:$0xff]  ;;  %s257_s18 = smov 1   ;;  %s258_s19 = smov 15   ;;  %v229_v14 = vld [vmem:[%s387_s1 + $0x10] sm:$0xff] }
   0x2   :  { %32 = vrot.lane.b32.xlu1 %v15_v0, %s255_s14  ;;  %17 = vrot.lane.b32.xlu0 %v15_v0, %s256_s15  ;;  %s259_s20 = smov 127   ;;  %s260_s21 = smov 113   ;;  %v291_v9 = vand.u32 127, %v21_v6  ;;  %v235_v12 = vld [vmem:[%s387_s1 + $0x40] sm:$0xff]  ;;  %v236_v13 = vld [vmem:[%s387_s1 + $0x48] sm:$0xff]  ;;  %vm180_vm9 = vcmp.lt.s32.totalorder %v21_v6, 256 }
   0x3   :  { %s261_s22 = smov 112   ;;  %s262_s23 = smov 111   ;;  %v230_v15 = vld [vmem:[%s387_s1 + $0x18] sm:$0xff]  ;;  %v78_v20 = vmul.f32 %v236_v13, %v16_v1  ;;  %v77_v21 = vmul.f32 %v235_v12, %v15_v0  ;;  %v26_v24 = vld [vmem:[%s387_s1] sm:$0xff]  ;;  %v27_v25 = vld [vmem:[%s387_s1 + $0x8] sm:$0xff] }
   0x4   :  { %vm36_vm0 = vcmp.lt.s32.totalorder %v291_v9, 16  ;;  %vm23_vm1 = vcmp.lt.s32.totalorder %v291_v9, 17  ;;  %vm64_vm2 = vcmp.lt.s32.totalorder %v291_v9, 1  ;;  %vm85_vm3 = vcmp.lt.s32.totalorder %v291_v9, 127  ;;  %v233_v30 = vld [vmem:[%s387_s1 + $0x30] sm:$0xff]  ;;  %v234_v31 = vld [vmem:[%s387_s1 + $0x38] sm:$0xff] }
   0x5   :  { %vm50_vm4 = vcmp.lt.s32.totalorder %v291_v9, 15  ;;  %vm99_vm5 = vcmp.lt.s32.totalorder %v291_v9, 113  ;;  %vm113_vm6 = vcmp.lt.s32.totalorder %v291_v9, 112  ;;  %vm127_vm7 = vcmp.lt.s32.totalorder %v291_v9, 111  ;;  %v237_v36 = vld [vmem:[%s387_s1 + $0x50] sm:$0xff]  ;;  %v238_v37 = vld [vmem:[%s387_s1 + $0x58] sm:$0xff] }
   0x6   :  { %34 = vrot.lane.b32.xlu1 %v16_v1, %s255_s14  ;;  %19 = vrot.lane.b32.xlu0 %v16_v1, %s256_s15  ;;  %v239_v40 = vld [vmem:[%s387_s1 + $0x60] sm:$0xff]  ;;  %v240_v43 = vld [vmem:[%s387_s1 + $0x68] sm:$0xff] }
   0x7   :  { %v241_v46 = vld [vmem:[%s387_s1 + $0x70] sm:$0xff]  ;;  %v242_v47 = vld [vmem:[%s387_s1 + $0x78] sm:$0xff]  ;;  %v231_v50 = vld [vmem:[%s387_s1 + $0x20] sm:$0xff] }
   0x8   :  { %v232_v51 = vld [vmem:[%s387_s1 + $0x28] sm:$0xff] }
   0xa   :  { %62 = vrot.lane.b32.xlu1 %v16_v1, %s257_s18  ;;  %60 = vrot.lane.b32.xlu0 %v15_v0, %s257_s18 }
   0xe   :  { %48 = vrot.lane.b32.xlu1 %v16_v1, %s258_s19  ;;  %46 = vrot.lane.b32.xlu0 %v15_v0, %s258_s19 }
  0x12   :  { %83 = vrot.lane.b32.xlu1 %v16_v1, %s259_s20  ;;  %81 = vrot.lane.b32.xlu0 %v15_v0, %s259_s20 }
  0x16   :  { %97 = vrot.lane.b32.xlu1 %v16_v1, %s260_s21  ;;  %95 = vrot.lane.b32.xlu0 %v15_v0, %s260_s21 }
  0x1a   :  { %111 = vrot.lane.b32.xlu1 %v16_v1, %s261_s22  ;;  %109 = vrot.lane.b32.xlu0 %v15_v0, %s261_s22 }
  0x1e   :  { %125 = vrot.lane.b32.xlu1 %v16_v1, %s262_s23  ;;  %123 = vrot.lane.b32.xlu0 %v15_v0, %s262_s23 }
  0x74   :  { %v33_v2 = vpop.permute.xlu1 %32  ;;  %v18_v3 = vpop.permute.xlu0 %17 }
  0x78   :  { %v35_v4 = vpop.permute.xlu1 %34  ;;  %v20_v5 = vpop.permute.xlu0 %19 }
  0x79   :  { %v37_v16 = vsel %vm36_vm0, %v33_v2, %v35_v4  ;;  %v38_v17 = vsel %vm36_vm0, %v35_v4, %v33_v2  ;;  %v24_v26 = vsel %vm23_vm1, %v18_v3, %v20_v5  ;;  %v25_v27 = vsel %vm23_vm1, %v20_v5, %v18_v3  ;;  %v243_v2 = vld [vmem:[%s387_s1 + $0x80] sm:$0xff]  ;;  %v244_v3 = vld [vmem:[%s387_s1 + $0x88] sm:$0xff] }
  0x7a   :  { %v42_v22 = vmul.f32 %v229_v14, %v38_v17  ;;  %v43_v23 = vmul.f32 %v230_v15, %v37_v16  ;;  %v28_v34 = vmul.f32 %v26_v24, %v25_v27  ;;  %v29_v35 = vmul.f32 %v27_v25, %v24_v26 }
  0x7c   :  { %v63_v7 = vpop.permute.xlu1 %62  ;;  %v61_v8 = vpop.permute.xlu0 %60  ;;  %v79_v41 = vadd.f32 %v77_v21, %v42_v22  ;;  %v80_v42 = vadd.f32 %v78_v20, %v43_v23 }
  0x7d   :  { %v65_v32 = vsel %vm64_vm2, %v61_v8, %v63_v7  ;;  %v66_v33 = vsel %vm64_vm2, %v63_v7, %v61_v8 }
  0x7e   :  { %v70_v48 = vmul.f32 %v233_v30, %v66_v33  ;;  %v71_v49 = vmul.f32 %v234_v31, %v65_v32 }
  0x80   :  { %v49_v10 = vpop.permute.xlu1 %48  ;;  %v47_v11 = vpop.permute.xlu0 %46  ;;  %v72_v4 = vadd.f32 %v70_v48, %v28_v34  ;;  %v73_v5 = vadd.f32 %v71_v49, %v29_v35  ;;  %v167_v48 = vshrl.u32 %v21_v6, 7 }
  0x81   :  { %v51_v52 = vsel %vm50_vm4, %v47_v11, %v49_v10  ;;  %v52_v53 = vsel %vm50_vm4, %v49_v10, %v47_v11 }
  0x82   :  { %v56_v0 = vmul.f32 %v231_v50, %v52_v53  ;;  %v57_v1 = vmul.f32 %v232_v51, %v51_v52  ;;  %v157_v53 = vstv %s388_s2 }
  0x84   :  { %v84_v18 = vpop.permute.xlu1 %83  ;;  %v82_v19 = vpop.permute.xlu0 %81 }
  0x85   :  { %v86_v38 = vsel %vm85_vm3, %v82_v19, %v84_v18  ;;  %v87_v39 = vsel %vm85_vm3, %v84_v18, %v82_v19 }
  0x86   :  { %v91_v56 = vmul.f32 %v237_v36, %v86_v38  ;;  %v92_v57 = vmul.f32 %v238_v37, %v87_v39  ;;  %v263_v37 = vmov 1966171168  }
  0x87   :  { %v164_v38 = vunpack.c.l.s4 %v263_v37 }
  0x88   :  { %v98_v28 = vpop.permute.xlu1 %97  ;;  %v96_v29 = vpop.permute.xlu0 %95  ;;  %v93_v12 = vadd.f32 %v91_v56, %v56_v0  ;;  %v94_v13 = vadd.f32 %v92_v57, %v57_v1 }
  0x89   :  { %v100_v44 = vsel %vm99_vm5, %v96_v29, %v98_v28  ;;  %v101_v45 = vsel %vm99_vm5, %v98_v28, %v96_v29 }
  0x8a   :  { %v105_v60 = vmul.f32 %v239_v40, %v100_v44  ;;  %v106_v61 = vmul.f32 %v240_v43, %v101_v45 }
  0x8c   :  { %v112_v54 = vpop.permute.xlu1 %111  ;;  %v110_v55 = vpop.permute.xlu0 %109  ;;  %v107_v16 = vadd.f32 %v105_v60, %v72_v4  ;;  %v108_v17 = vadd.f32 %v106_v61, %v73_v5 }
  0x8d   :  { %v114_v58 = vsel %vm113_vm6, %v110_v55, %v112_v54  ;;  %v115_v59 = vsel %vm113_vm6, %v112_v54, %v110_v55 }
  0x8e   :  { %v119_v62 = vmul.f32 %v241_v46, %v114_v58  ;;  %v120_v63 = vmul.f32 %v242_v47, %v115_v59  ;;  %v165_v47 = vunpack.c.0.s8 %v164_v38 }
  0x90   :  { %v121_v7 = vadd.f32 %v119_v62, %v79_v41  ;;  %v122_v8 = vadd.f32 %v120_v63, %v80_v42  ;;  %v126_v10 = vpop.permute.xlu1 %125  ;;  %v124_v11 = vpop.permute.xlu0 %123  ;;  %v168_v58 = vsub.s32 %v165_v47, %v167_v48 }
  0x91   :  { %v128_v14 = vsel %vm127_vm7, %v124_v11, %v126_v10  ;;  %v129_v15 = vsel %vm127_vm7, %v126_v10, %v124_v11 }
  0x92   :  { %v133_v18 = vmul.f32 %v243_v2, %v128_v14  ;;  %v134_v19 = vmul.f32 %v244_v3, %v129_v15  ;;  %v137_v20 = vadd.f32 %v121_v7, %v107_v16  ;;  %v138_v21 = vadd.f32 %v122_v8, %v108_v17 }
  0x94   :  { %v135_v22 = vadd.f32 %v133_v18, %v93_v12  ;;  %v136_v23 = vadd.f32 %v134_v19, %v94_v13 }
  0x96   :  { %v139_v24 = vadd.f32 %v137_v20, %v135_v22  ;;  %v140_v25 = vadd.f32 %v138_v21, %v136_v23 }
  0x98   :  { %v143_v26 = vsel %vm142_vm8, %v139_v24, 0.0  ;;  %v150_v27 = vsel %vm142_vm8, %v140_v25, 0.0  ;;  %v185_v28 = vrot.slane %v139_v24, 4  ;;  %v186_v29 = vrot.slane %v140_v25, 4 }
  0x99   :  { %v144_v30 = vrot.slane %v143_v26, 4  ;;  %v151_v31 = vrot.slane %v150_v27, 4 }
  0x9a   :  { %v189_v32 = vsel %vm142_vm8, %v185_v28, 0.0  ;;  %v196_v9 = vsel %vm142_vm8, %v186_v29, 0.0 }
  0x9b   :  { %v145_v33 = vadd.f32 %v144_v30, %v143_v26  ;;  %v152_v34 = vadd.f32 %v151_v31, %v150_v27  ;;  %v190_v35 = vrot.slane %v189_v32, 4  ;;  %v197_v36 = vrot.slane %v196_v9, 4 }
  0x9d   :  { %v146_v39 = vrot.slane %v145_v33, 2  ;;  %v153_v40 = vrot.slane %v152_v34, 2  ;;  %v191_v41 = vadd.f32 %v190_v35, %v189_v32  ;;  %v198_v42 = vadd.f32 %v197_v36, %v196_v9 }
  0x9f   :  { %v147_v43 = vadd.f32 %v146_v39, %v145_v33  ;;  %v154_v44 = vadd.f32 %v153_v40, %v152_v34  ;;  %v192_v45 = vrot.slane %v191_v41, 2  ;;  %v199_v46 = vrot.slane %v198_v42, 2 }
  0xa1   :  { %v148_v49 = vrot.slane %v147_v43, 1  ;;  %v155_v50 = vrot.slane %v154_v44, 1  ;;  %v193_v51 = vadd.f32 %v192_v45, %v191_v41  ;;  %v200_v52 = vadd.f32 %v199_v46, %v198_v42 }
  0xa3   :  { %v149_v54 = vadd.f32 %v148_v49, %v147_v43  ;;  %v156_v55 = vadd.f32 %v155_v50, %v154_v44  ;;  %v194_v56 = vrot.slane %v193_v51, 1  ;;  %v201_v57 = vrot.slane %v200_v52, 1 }
  0xa5   :  { %v158_v59 = vadd.f32 %v157_v53, %v149_v54  ;;  %v159_v60 = vadd.f32 %v157_v53, %v156_v55  ;;  %v195_v61 = vadd.f32 %v194_v56, %v193_v51  ;;  %v202_v62 = vadd.f32 %v201_v57, %v200_v52 }
  0xa7   :  { %v162_v63 = vcombine.low %v158_v59, %v159_v60  ;;  %v203_v0 = vadd.f32 %v195_v61, %v157_v53  ;;  %v204_v1 = vadd.f32 %v202_v62, %v157_v53 }
  0xa9   :  { %v169_v2 = vrot.slane %v162_v63, %v168_v58  ;;  %v207_v3 = vcombine.low %v203_v0, %v204_v1 }
  0xab   :  { %v176_v4 = vrot.slane %v169_v2, %v168_v58  ;;  %v214_v5 = vrot.slane %v207_v3, %v168_v58 }
  0xad   :  { %182 = vst.msk [vmem:[%s389_s3] ss:$2 sm:$0x3] %vm180_vm9, %v176_v4  ;;  %v221_v7 = vrot.slane %v214_v5, %v168_v58 }
  0xaf   :  { %245 = vst.msk [vmem:[%s389_s3 + $0x1] ss:$2 sm:$0x3] %vm180_vm9, %v221_v7 }

</bundles_post_ra>
